<compile_context>
chip_gen: v6e
topology: v6e:2x2x1
jax: 0.10.0
libtpu: 0.0.40
codegen_flags: <defaults>
</compile_context>

<pallas_src>
import functools

import jax
import jax.numpy as jnp
from jax.experimental import pallas as pl
from jax.experimental.pallas import tpu as pltpu


_SMALL_INPUT_BYPASS_BYTES = 256 * 1024  # below this, XLA slices beat a custom call


def _split_channels_kernel(x_ref, o0_ref, o1_ref, o2_ref):
    # x_ref: (nb, 3*HW) lane-dense block of v1.  Static, lane-aligned column
    # slices (starts 0, HW, 2*HW are multiples of 128 when HW % 128 == 0), so
    # each output is a full-width unmasked vector store stream.
    hw = o0_ref.shape[-1]
    o0_ref[...] = x_ref[:, 0 * hw:1 * hw]
    o1_ref[...] = x_ref[:, 1 * hw:2 * hw]
    o2_ref[...] = x_ref[:, 2 * hw:3 * hw]


def _choose_row_block(n_rows, row_bytes, target_bytes=4 << 20):
    """Pick a row-block size: whole array if small, else ~4 MiB chunks.

    Returned value is either == n_rows (full dim, always legal) or a multiple
    of 8 (sublane-aligned) so the BlockSpec satisfies the (8,128) constraint
    on the second-to-last dim.
    """
    if n_rows * row_bytes <= target_bytes:
        return n_rows
    nb = max(8, (target_bytes // max(row_bytes, 1)) // 8 * 8)
    return int(min(nb, n_rows))


def split_channels_pallas(v1):
    """torch.split(v1, [1,1,1], dim=1) as one fused, lane-dense Pallas pass.

    v1: (N, 3, H, W) -> 3 x (N, 1, H, W), reading v1 from HBM exactly once.
    """
    N, C, H, W = v1.shape
    assert C == 3, "split([1,1,1], dim=1) requires exactly 3 channels"
    hw = H * W                            # 16*16 = 256, a multiple of 128
    feat = C * hw                         # 768
    flat = v1.reshape(N, feat)            # bitcast view under row-major layout

    itemsize = jnp.dtype(v1.dtype).itemsize
    nb = _choose_row_block(N, feat * itemsize)
    grid = (pl.cdiv(N, nb),)              # (1,) for the small example shapes

    outs = pl.pallas_call(
        _split_channels_kernel,
        out_shape=tuple(
            jax.ShapeDtypeStruct((N, hw), v1.dtype) for _ in range(3)
        ),
        grid_spec=pl.GridSpec(
            grid=grid,
            in_specs=[pl.BlockSpec((nb, feat), lambda i: (i, 0))],
            out_specs=[pl.BlockSpec((nb, hw), lambda i: (i, 0))] * 3,
        ),
        compiler_params=pltpu.CompilerParams(
            dimension_semantics=("parallel",),
        ),
        cost_estimate=pl.CostEstimate(
            flops=0,
            transcendentals=0,
            # read N*3*HW + write 3*(N*HW)
            bytes_accessed=2 * N * feat * itemsize,
        ),
    )(flat)
    return tuple(o.reshape(N, 1, H, W) for o in outs)


def init_unused_feature_params(key):
    """Deterministic init of the (unused) Conv2d params from __init__.

    Conv2d(3,32,7,2,3), Conv2d(32,64,3,2,1), Conv2d(64,128,3,1,1) — created
    for shape fidelity only; forward() never touches them.
    """
    k1, k2, k3 = jax.random.split(key, 3)
    return {
        "conv0_w": jax.random.normal(k1, (32, 3, 7, 7), jnp.float32) * 0.02,
        "conv0_b": jnp.zeros((32,), jnp.float32),
        "conv1_w": jax.random.normal(k2, (64, 32, 3, 3), jnp.float32) * 0.02,
        "conv1_b": jnp.zeros((64,), jnp.float32),
        "conv2_w": jax.random.normal(k3, (128, 64, 3, 3), jnp.float32) * 0.02,
        "conv2_b": jnp.zeros((128,), jnp.float32),
    }


@functools.partial(jax.jit, static_argnames=("force_kernel",))
def model_forward(v1, force_kernel=False):
    """Mirrors Model.forward: returns (concatenated_tensor, split_tensors)."""
    # torch.cat(torch.split(v1, [1,1,1], dim=1), dim=1) is the identity:
    # return v1 directly — zero HBM traffic, no kernel launch.
    concatenated = v1

    total_bytes = v1.size * jnp.dtype(v1.dtype).itemsize
    if force_kernel or total_bytes >= _SMALL_INPUT_BYPASS_BYTES:
        # Fused single-read, lane-dense split kernel.
        splits = split_channels_pallas(v1)
    else:
        # Tiny inputs: custom-call overhead would dominate — plain slices.
        splits = (v1[:, 0:1, :, :], v1[:, 1:2, :, :], v1[:, 2:3, :, :])
    return concatenated, splits


if __name__ == "__main__":
    key = jax.random.PRNGKey(0)
    k_x, k_p = jax.random.split(key)

    # Input must have exactly 3 channels for split([1,1,1], dim=1).
    x = jax.random.normal(k_x, (2, 3, 16, 16), jnp.float32)

    # Deterministic (unused) feature params, for fidelity with __init__.
    _ = init_unused_feature_params(k_p)

    # Force the Pallas path so the kernel is exercised at this tiny shape.
    concat_out, splits = model_forward(x, force_kernel=True)
    concat_out = jax.block_until_ready(concat_out)
    splits = jax.tree_util.tree_map(jax.block_until_ready, splits)

    # Semantics checks.
    assert concat_out.shape == x.shape
    assert jnp.array_equal(concat_out, x)
    assert all(s.shape == (2, 1, 16, 16) for s in splits)
    for c, s in enumerate(splits):
        assert jnp.array_equal(s, x[:, c:c + 1, :, :])
    assert jnp.array_equal(jnp.concatenate(splits, axis=1), x)

    print("KERNEL_OK")
</pallas_src>

<mosaic_0001>
module attributes {stable_mosaic.version = 11 : i64} {
  func.func @_split_channels_kernel(%arg0: i32, %arg1: memref<2x768xf32, #tpu.memory_space<vmem>>, %arg2: memref<2x256xf32, #tpu.memory_space<vmem>>, %arg3: memref<2x256xf32, #tpu.memory_space<vmem>>, %arg4: memref<2x256xf32, #tpu.memory_space<vmem>>) attributes {dimension_semantics = [#tpu.dimension_semantics<parallel>], iteration_bounds = array<i64: 1>, scalar_prefetch = 0 : i64, scratch_operands = 0 : i64, tpu.core_type = #tpu.core_type<tc>, window_params = [{transform_indices = @transform_0, window_bounds = array<i64: 2, 768>}, {transform_indices = @transform_1, window_bounds = array<i64: 2, 256>}, {transform_indices = @transform_2, window_bounds = array<i64: 2, 256>}, {transform_indices = @transform_3, window_bounds = array<i64: 2, 256>}]} {
    %c0 = arith.constant 0 : index
    %c0_0 = arith.constant 0 : index
    %0 = vector.load %arg1[%c0, %c0_0] : memref<2x768xf32, #tpu.memory_space<vmem>>, vector<2x256xf32>
    %c0_1 = arith.constant 0 : index
    %c0_2 = arith.constant 0 : index
    %1 = vector.load %arg2[%c0_1, %c0_2] : memref<2x256xf32, #tpu.memory_space<vmem>>, vector<2x256xf32>
    tpu.vector_store %arg2[%c0_1, %c0_2], %0 {strides = array<i32>} : memref<2x256xf32, #tpu.memory_space<vmem>>, vector<2x256xf32>,
    %c0_3 = arith.constant 0 : index
    %c256 = arith.constant 256 : index
    %2 = vector.load %arg1[%c0_3, %c256] : memref<2x768xf32, #tpu.memory_space<vmem>>, vector<2x256xf32>
    %c0_4 = arith.constant 0 : index
    %c0_5 = arith.constant 0 : index
    %3 = vector.load %arg3[%c0_4, %c0_5] : memref<2x256xf32, #tpu.memory_space<vmem>>, vector<2x256xf32>
    tpu.vector_store %arg3[%c0_4, %c0_5], %2 {strides = array<i32>} : memref<2x256xf32, #tpu.memory_space<vmem>>, vector<2x256xf32>,
    %c0_6 = arith.constant 0 : index
    %c512 = arith.constant 512 : index
    %4 = vector.load %arg1[%c0_6, %c512] : memref<2x768xf32, #tpu.memory_space<vmem>>, vector<2x256xf32>
    %c0_7 = arith.constant 0 : index
    %c0_8 = arith.constant 0 : index
    %5 = vector.load %arg4[%c0_7, %c0_8] : memref<2x256xf32, #tpu.memory_space<vmem>>, vector<2x256xf32>
    tpu.vector_store %arg4[%c0_7, %c0_8], %4 {strides = array<i32>} : memref<2x256xf32, #tpu.memory_space<vmem>>, vector<2x256xf32>,
    return
  }
  func.func @transform_0(%arg0: i32) -> (i32, i32) {
    %c0_i32 = arith.constant 0 : i32
    %c0_i32_0 = arith.constant 0 : i32
    return %arg0, %c0_i32 : i32, i32
  }
  func.func @transform_1(%arg0: i32) -> (i32, i32) {
    %c0_i32 = arith.constant 0 : i32
    %c0_i32_0 = arith.constant 0 : i32
    return %arg0, %c0_i32 : i32, i32
  }
  func.func @transform_2(%arg0: i32) -> (i32, i32) {
    %c0_i32 = arith.constant 0 : i32
    %c0_i32_0 = arith.constant 0 : i32
    return %arg0, %c0_i32 : i32, i32
  }
  func.func @transform_3(%arg0: i32) -> (i32, i32) {
    %c0_i32 = arith.constant 0 : i32
    %c0_i32_0 = arith.constant 0 : i32
    return %arg0, %c0_i32 : i32, i32
  }
}

</mosaic_0001>

<bundles_post_ra>
// kernel: model_forward.1
= control target key start
LH: loop header
LB: loop body
LE: loop exit
PB: predicated region body
PF: predicated region fallthrough
CT: control target
= control target key end

     0   :  { %s67_s0 = inlined_call_operand.vmem [shape: f32[2,768], index: 0, kind: input, shape index: {}]   ;;  %s68_s1 = inlined_call_operand.vmem [shape: f32[2,256], index: 1, kind: output, shape index: {0}]   ;;  %s69_s2 = inlined_call_operand.vmem [shape: f32[2,256], index: 2, kind: output, shape index: {1}]   ;;  %s70_s3 = inlined_call_operand.vmem [shape: f32[2,256], index: 3, kind: output, shape index: {2}]  }
   0x1   :  { %v11_v0 = vld [vmem:[%s67_s0] sm:$0xf]  ;;  %v13_v1 = vld [vmem:[%s67_s0 + $0x4] sm:$0xf]  ;;  %v15_v2 = vld [vmem:[%s67_s0 + $0x8] sm:$0xf] }
   0x2   :  { %12 = vst [vmem:[%s68_s1] sm:$0xf] %v11_v0  ;;  %14 = vst [vmem:[%s69_s2] sm:$0xf] %v13_v1 }
   0x3   :  { %16 = vst [vmem:[%s70_s3] sm:$0xf] %v15_v2 }

</bundles_post_ra>
